<compile_context>
chip_gen: v7x
topology: tpu7x:2x2x1
jax: 0.10.0
libtpu: 0.0.40
codegen_flags: <defaults>
</compile_context>

<pallas_src>
import math

import jax
import jax.numpy as jnp
import numpy as np
from jax.experimental import pallas as pl
from jax.experimental.pallas import tpu as pltpu


def _pooled_max(feat, bm):
    """Per-batch max over the V consecutive view rows of a (bm*V, D) tile."""
    tm, d = feat.shape
    v = tm // bm
    # Rows are (b, v) b-major / v-minor -> group-max over the middle axis.
    # TODO(synk): if the bundle dump ever shows a VMEM retile copy here (V not
    # a multiple of 8), replace with an unrolled jnp.maximum tree.
    return jnp.max(feat.reshape(bm, v, d), axis=1)


def _single_step_kernel(x_ref, w_ref, b_ref, aux_ref, pooled_ref):
    """Weight-resident fast path (no K grid axis, no predication).

    x_ref:      (tm, F)  rows are (batch, view) pairs, b-major / v-minor
    w_ref:      (F, D)   full projection weight (constant block index -> DMA'd once)
    b_ref:      (1, D)   projection bias
    aux_ref:    (tm, D)  per-(batch, view) features
    pooled_ref: (bm, D)  per-batch max over the V views of this M tile
    """
    feat = jnp.dot(x_ref[...], w_ref[...], preferred_element_type=jnp.float32)
    feat = feat + b_ref[...]
    aux_ref[...] = feat
    pooled_ref[...] = _pooled_max(feat, pooled_ref.shape[0])


def _multi_step_kernel(x_ref, w_ref, b_ref, aux_ref, pooled_ref):
    """General path: grid = (M tiles, K tiles), K innermost ("arbitrary").

    The aux output block (constant index over K) doubles as the resident f32
    accumulator.  The bias add + view-max epilogue is merged into the final K
    step so the accumulator is read-modify-written exactly once there.
    The wrapper guarantees nk >= 2 for this kernel.
    """
    k = pl.program_id(1)
    nk = pl.num_programs(1)
    partial = jnp.dot(x_ref[...], w_ref[...], preferred_element_type=jnp.float32)

    @pl.when(k == 0)
    def _():
        aux_ref[...] = partial

    @pl.when(jnp.logical_and(k > 0, k < nk - 1))
    def _():
        aux_ref[...] += partial

    @pl.when(k == nk - 1)
    def _():
        feat = aux_ref[...] + partial + b_ref[...]     # merged bias epilogue
        aux_ref[...] = feat
        pooled_ref[...] = _pooled_max(feat, pooled_ref.shape[0])


def _divisors_desc(n):
    return [d for d in range(n, 0, -1) if n % d == 0]


def _working_set_bytes(bm, tk, V, D, in_item):
    tm = bm * V
    x_b = 2 * tm * tk * in_item       # double-buffered x tile
    w_b = 2 * tk * D * in_item        # double-buffered weight tile
    aux_b = 2 * tm * D * 4            # f32 aux / accumulator block
    pooled_b = 2 * bm * D * 4
    bias_b = 2 * 8 * D * 4            # (1, D) block, sublane-padded
    return x_b + w_b + aux_b + pooled_b + bias_b


def _choose_tiles(B, V, F, D, in_item, budget_bytes):
    """Pick (bm, tk) obeying the (8,128) block rule and a VMEM budget.

    bm is a multiple of 8 or the full batch B; tk is a multiple of 128 or the
    full feature dim F.  Preference: (1) weight resident (tk == F -> weight
    DMA'd once total), (2) >= 2 M tiles (v7x megacore + pipeline overlap),
    (3) the largest bm / tk that fit the budget.
    """
    bm_cands = [d for d in _divisors_desc(B) if d % 8 == 0 or d == B]
    bm_pref = ([d for d in bm_cands if B // d >= 2]
               + [d for d in bm_cands if B // d < 2])
    tk_cands = [d for d in _divisors_desc(F) if d % 128 == 0 or d == F]
    if F not in tk_cands:
        tk_cands = [F] + tk_cands

    for bm in bm_pref:                      # pass 1: weight-resident fast path
        if _working_set_bytes(bm, F, V, D, in_item) <= budget_bytes:
            return bm, F
    for bm in bm_pref:                      # pass 2: tile the K (feature) axis
        for tk in tk_cands:
            if _working_set_bytes(bm, tk, V, D, in_item) <= budget_bytes:
                return bm, tk
    return min(bm_cands), min(tk_cands)     # fallback: smallest legal blocks


def view_max_aggregate(mvimages, w, b, *, use_bf16=False,
                       vmem_budget_bytes=28 * 1024 * 1024):
    """ViewMaxAggregate forward.

    mvimages: (B, V, *feat_dims) f32, prod(feat_dims) == F
    w: (F, D), b: (D,)  -- the wrapped `model` (flatten + dense projection)

    Returns (pooled_view.squeeze(), aux):
      pooled: (B, D) max over views (all size-1 dims squeezed, like torch)
      aux:    (B, V, D) per-view features (lifting_net == identity)
    """
    B, V = mvimages.shape[:2]
    F = math.prod(mvimages.shape[2:])
    D = w.shape[1]

    x = mvimages.reshape(B * V, F)        # contiguous flatten, rows (b, v) b-major
    b2 = b.reshape(1, D).astype(jnp.float32)

    if use_bf16:
        # bf16 operands, f32 accumulation: halves HBM bytes on the dominant
        # x / w streams and runs the MXU at native bf16 rate.
        x = x.astype(jnp.bfloat16)
        w = w.astype(jnp.bfloat16)
    in_item = jnp.dtype(x.dtype).itemsize

    bm, tk = _choose_tiles(B, V, F, D, in_item, vmem_budget_bytes)
    tm = bm * V
    nm = B // bm
    nk = F // tk

    working = _working_set_bytes(bm, tk, V, D, in_item)
    # Scoped-VMEM limit: room for the chosen tiles plus headroom, kept below
    # v7x's 64 MiB physical VMEM (also fine for v5e/v6e's 128 MiB).
    vmem_limit = int(min(48 * 1024 * 1024, max(32 * 1024 * 1024, 2 * working)))

    cost = pl.CostEstimate(
        flops=2 * B * V * F * D,
        transcendentals=0,
        bytes_accessed=int(B * V * F * in_item                       # x read once
                           + F * D * in_item * (1 if nk == 1 else nm)  # w (re)streams
                           + B * V * D * 4 + B * D * 4),             # aux + pooled
    )

    out_shape = (
        jax.ShapeDtypeStruct((B * V, D), jnp.float32),   # aux, rows (b, v) b-major
        jax.ShapeDtypeStruct((B, D), jnp.float32),       # pooled view-max
    )

    if nk == 1:
        kernel = _single_step_kernel
        grid = (nm,)
        in_specs = [
            pl.BlockSpec((tm, F), lambda m: (m, 0)),     # x tile
            pl.BlockSpec((F, D), lambda m: (0, 0)),      # weight: resident, DMA'd once
            pl.BlockSpec((1, D), lambda m: (0, 0)),      # bias
        ]
        out_specs = [
            pl.BlockSpec((tm, D), lambda m: (m, 0)),     # aux
            pl.BlockSpec((bm, D), lambda m: (m, 0)),     # pooled
        ]
        dim_sem = ("parallel",)
    else:
        kernel = _multi_step_kernel
        grid = (nm, nk)
        in_specs = [
            pl.BlockSpec((tm, tk), lambda m, k: (m, k)),   # x tile
            pl.BlockSpec((tk, D), lambda m, k: (k, 0)),    # weight K-slice
            pl.BlockSpec((1, D), lambda m, k: (0, 0)),     # bias
        ]
        out_specs = [
            pl.BlockSpec((tm, D), lambda m, k: (m, 0)),    # aux / resident accumulator
            pl.BlockSpec((bm, D), lambda m, k: (m, 0)),    # pooled
        ]
        dim_sem = ("parallel", "arbitrary")

    aux_flat, pooled = pl.pallas_call(
        kernel,
        out_shape=out_shape,
        grid_spec=pltpu.PrefetchScalarGridSpec(
            num_scalar_prefetch=0,
            grid=grid,
            in_specs=in_specs,
            out_specs=out_specs,
        ),
        compiler_params=pltpu.CompilerParams(
            dimension_semantics=dim_sem,
            vmem_limit_bytes=vmem_limit,
        ),
        cost_estimate=cost,
    )(x, w, b2)

    aux = aux_flat.reshape(B, V, D)           # free reshape, no transpose
    pooled_view = pooled.reshape(B, -1)       # .view(B, -1)
    # torch .squeeze(): drops ALL size-1 dims (B == 1 -> (D,)).
    return jnp.squeeze(pooled_view), aux


if __name__ == "__main__":
    key = jax.random.PRNGKey(0)
    kx, kw, kb = jax.random.split(key, 3)

    # Small shapes: batch=8, views=4, channels=4, spatial 16x16, hidden=128.
    B, V, C, H, W = 8, 4, 4, 16, 16
    F = C * H * W
    D = 128

    mvimages = jax.random.normal(kx, (B, V, C, H, W), dtype=jnp.float32)
    w = jax.random.normal(kw, (F, D), dtype=jnp.float32) * 0.02
    b = jax.random.normal(kb, (D,), dtype=jnp.float32) * 0.01

    fwd = jax.jit(view_max_aggregate,
                  static_argnames=("use_bf16", "vmem_budget_bytes"))

    # 1) f32, weight-resident single-step path (default budget).
    pooled, aux = fwd(mvimages, w, b)
    jax.block_until_ready((pooled, aux))

    # 2) tiny VMEM budget -> forces K tiling and exercises the multi-step kernel.
    pooled_mk, aux_mk = fwd(mvimages, w, b, vmem_budget_bytes=1 * 1024 * 1024)
    jax.block_until_ready((pooled_mk, aux_mk))

    # 3) bf16-operand path (f32 accumulation), relaxed tolerance.
    pooled_bf, aux_bf = fwd(mvimages, w, b, use_bf16=True)
    jax.block_until_ready((pooled_bf, aux_bf))

    # Float64 numpy reference.
    feats_ref = (np.asarray(mvimages, dtype=np.float64).reshape(B, V, F)
                 @ np.asarray(w, dtype=np.float64)
                 + np.asarray(b, dtype=np.float64))          # (B, V, D)
    pooled_ref = feats_ref.max(axis=1)                       # (B, D)

    assert aux.shape == (B, V, D) and pooled.shape == (B, D)
    assert np.allclose(np.asarray(aux), feats_ref, atol=2e-2, rtol=2e-2)
    assert np.allclose(np.asarray(pooled), pooled_ref, atol=2e-2, rtol=2e-2)
    assert np.allclose(np.asarray(aux_mk), feats_ref, atol=2e-2, rtol=2e-2)
    assert np.allclose(np.asarray(pooled_mk), pooled_ref, atol=2e-2, rtol=2e-2)
    assert np.allclose(np.asarray(aux_bf), feats_ref, atol=1e-1, rtol=1e-1)
    assert np.allclose(np.asarray(pooled_bf), pooled_ref, atol=1e-1, rtol=1e-1)

    print("KERNEL_OK")
</pallas_src>

<mosaic_0001>
module attributes {stable_mosaic.version = 11 : i64} {
  func.func @_single_step_kernel(%arg0: i32, %arg1: memref<32x1024xf32, #tpu.memory_space<vmem>>, %arg2: memref<1024x128xf32, #tpu.memory_space<vmem>>, %arg3: memref<1x128xf32, #tpu.memory_space<vmem>>, %arg4: memref<32x128xf32, #tpu.memory_space<vmem>>, %arg5: memref<8x128xf32, #tpu.memory_space<vmem>>) attributes {dimension_semantics = [#tpu.dimension_semantics<parallel>], iteration_bounds = array<i64: 1>, scalar_prefetch = 0 : i64, scratch_operands = 0 : i64, tpu.core_type = #tpu.core_type<tc>, window_params = [{transform_indices = @transform_0, window_bounds = array<i64: 32, 1024>}, {pipeline_mode = #tpu.pipeline_mode<synchronous>, transform_indices = @transform_1, window_bounds = array<i64: 1024, 128>}, {pipeline_mode = #tpu.pipeline_mode<synchronous>, transform_indices = @transform_2, window_bounds = array<i64: 1, 128>}, {transform_indices = @transform_3, window_bounds = array<i64: 32, 128>}, {transform_indices = @transform_4, window_bounds = array<i64: 8, 128>}]} {
    %c0 = arith.constant 0 : index
    %c0_0 = arith.constant 0 : index
    %0 = vector.load %arg1[%c0, %c0_0] : memref<32x1024xf32, #tpu.memory_space<vmem>>, vector<32x1024xf32>
    %c0_1 = arith.constant 0 : index
    %c0_2 = arith.constant 0 : index
    %1 = vector.load %arg2[%c0_1, %c0_2] : memref<1024x128xf32, #tpu.memory_space<vmem>>, vector<1024x128xf32>
    %cst = arith.constant dense<0.000000e+00> : vector<32x128xf32>
    %2 = tpu.matmul %0, %1, %cst {dimension_numbers = #tpu.dot_dimension_numbers<[1], [0], [0], [1], [0, 0, 1, 1], [], []>} : vector<32x1024xf32>, vector<1024x128xf32>, vector<32x128xf32> -> vector<32x128xf32>
    %c0_3 = arith.constant 0 : index
    %c0_4 = arith.constant 0 : index
    %3 = vector.load %arg3[%c0_3, %c0_4] : memref<1x128xf32, #tpu.memory_space<vmem>>, vector<1x128xf32>
    %4 = vector.broadcast %3 : vector<1x128xf32> to vector<32x128xf32>
    %5 = arith.addf %2, %4 : vector<32x128xf32>
    %c0_5 = arith.constant 0 : index
    %c0_6 = arith.constant 0 : index
    %6 = vector.load %arg4[%c0_5, %c0_6] : memref<32x128xf32, #tpu.memory_space<vmem>>, vector<32x128xf32>
    tpu.vector_store %arg4[%c0_5, %c0_6], %5 {strides = array<i32>} : memref<32x128xf32, #tpu.memory_space<vmem>>, vector<32x128xf32>,
    %7 = vector.shape_cast %5 : vector<32x128xf32> to vector<8x4x128xf32>
    %cst_7 = arith.constant dense<0xFF800000> : vector<8x128xf32>
    %8 = vector.multi_reduction <maximumf>, %7, %cst_7 [1] : vector<8x4x128xf32> to vector<8x128xf32>
    %c0_8 = arith.constant 0 : index
    %c0_9 = arith.constant 0 : index
    %9 = vector.load %arg5[%c0_8, %c0_9] : memref<8x128xf32, #tpu.memory_space<vmem>>, vector<8x128xf32>
    tpu.vector_store %arg5[%c0_8, %c0_9], %8 {strides = array<i32>} : memref<8x128xf32, #tpu.memory_space<vmem>>, vector<8x128xf32>,
    return
  }
  func.func @transform_0(%arg0: i32) -> (i32, i32) {
    %c0_i32 = arith.constant 0 : i32
    %c0_i32_0 = arith.constant 0 : i32
    return %arg0, %c0_i32 : i32, i32
  }
  func.func @transform_1(%arg0: i32) -> (i32, i32) {
    %c0_i32 = arith.constant 0 : i32
    %c0_i32_0 = arith.constant 0 : i32
    %c0_i32_1 = arith.constant 0 : i32
    return %c0_i32, %c0_i32_0 : i32, i32
  }
  func.func @transform_2(%arg0: i32) -> (i32, i32) {
    %c0_i32 = arith.constant 0 : i32
    %c0_i32_0 = arith.constant 0 : i32
    %c0_i32_1 = arith.constant 0 : i32
    return %c0_i32, %c0_i32_0 : i32, i32
  }
  func.func @transform_3(%arg0: i32) -> (i32, i32) {
    %c0_i32 = arith.constant 0 : i32
    %c0_i32_0 = arith.constant 0 : i32
    return %arg0, %c0_i32 : i32, i32
  }
  func.func @transform_4(%arg0: i32) -> (i32, i32) {
    %c0_i32 = arith.constant 0 : i32
    %c0_i32_0 = arith.constant 0 : i32
    return %arg0, %c0_i32 : i32, i32
  }
}

</mosaic_0001>

<bundles_post_ra>
// kernel: view_max_aggregate.1
= control target key start
LH: loop header
LB: loop body
LE: loop exit
PB: predicated region body
PF: predicated region fallthrough
CT: control target
= control target key end

     0   :  { %10 = vsyncpa [#allocation3], 0  ;;  %s1562_s0 = inlined_call_operand.vmem [shape: f32[32,1024], index: 0, kind: input, shape index: {}]   ;;  %s1563_s1 = inlined_call_operand.vmem [shape: f32[1024,128], index: 1, kind: input, shape index: {}]   ;;  %s1564_s2 = inlined_call_operand.vmem [shape: f32[1,128], index: 2, kind: input, shape index: {}]   ;;  %s1565_s3 = inlined_call_operand.hbm [shape: f32[32,128], index: 3, kind: output, shape index: {0}]   ;;  %s1566_s4 = inlined_call_operand.hbm [shape: f32[8,128], index: 4, kind: output, shape index: {1}]  }
   0x1   :  { %v66_v0 = vld [vmem:[%s1563_s1 + $0x80] sm:$0xff]  ;;  %v67_v1 = vld [vmem:[%s1563_s1 + $0x88] sm:$0xff]  ;;  %v68_v11 = vld [vmem:[%s1563_s1 + $0x90] sm:$0xff] }
   0x2   :  { %v50_v2 = vld [vmem:[%s1563_s1] sm:$0xff]  ;;  %v829_v3 = vpack.c.bf16 %v67_v1, %v66_v0  ;;  %v51_v4 = vld [vmem:[%s1563_s1 + $0x8] sm:$0xff]  ;;  %v69_v13 = vld [vmem:[%s1563_s1 + $0x98] sm:$0xff] }
   0x3   :  { %v98_v5 = vld [vmem:[%s1563_s1 + $0x180] sm:$0xff]  ;;  %v99_v6 = vld [vmem:[%s1563_s1 + $0x188] sm:$0xff]  ;;  %v831_v7 = vpack.c.bf16 %v51_v4, %v50_v2  ;;  %v52_v14 = vld [vmem:[%s1563_s1 + $0x10] sm:$0xff]  ;;  %v833_v16 = vpack.c.bf16 %v69_v13, %v68_v11 }
   0x4   :  { %v861_v8 = vpack.c.bf16 %v99_v6, %v98_v5  ;;  %v82_v9 = vld [vmem:[%s1563_s1 + $0x100] sm:$0xff]  ;;  %v83_v10 = vld [vmem:[%s1563_s1 + $0x108] sm:$0xff]  ;;  %830 = vmatprep.subr.bf16.mxu0 %v829_v3  ;;  %v53_v15 = vld [vmem:[%s1563_s1 + $0x18] sm:$0xff] }
   0x5   :  { %v863_v12 = vpack.c.bf16 %v83_v10, %v82_v9  ;;  %832 = vmatpush3.bf16.msra.mxu0 %v831_v7  ;;  %v835_v17 = vpack.c.bf16 %v53_v15, %v52_v14  ;;  %v100_v18 = vld [vmem:[%s1563_s1 + $0x190] sm:$0xff]  ;;  %v101_v19 = vld [vmem:[%s1563_s1 + $0x198] sm:$0xff]  ;;  %v70_v23 = vld [vmem:[%s1563_s1 + $0xa0] sm:$0xff] }
   0x6   :  { %862 = vmatprep.subr.bf16.mxu1 %v861_v8  ;;  %v84_v20 = vld [vmem:[%s1563_s1 + $0x110] sm:$0xff]  ;;  %v865_v21 = vpack.c.bf16 %v101_v19, %v100_v18  ;;  %v85_v22 = vld [vmem:[%s1563_s1 + $0x118] sm:$0xff]  ;;  %v71_v24 = vld [vmem:[%s1563_s1 + $0xa8] sm:$0xff]  ;;  %834 = vmatprep.subr.bf16.mxu0 %v833_v16 }
   0x7   :  { %864 = vmatpush3.bf16.msra.mxu1 %v863_v12  ;;  %v867_v25 = vpack.c.bf16 %v85_v22, %v84_v20  ;;  %v837_v26 = vpack.c.bf16 %v71_v24, %v70_v23  ;;  %v54_v27 = vld [vmem:[%s1563_s1 + $0x20] sm:$0xff]  ;;  %v55_v28 = vld [vmem:[%s1563_s1 + $0x28] sm:$0xff]  ;;  %v72_v35 = vld [vmem:[%s1563_s1 + $0xb0] sm:$0xff] }
   0x8   :  { %v102_v29 = vld [vmem:[%s1563_s1 + $0x1a0] sm:$0xff]  ;;  %866 = vmatprep.subr.bf16.mxu1 %v865_v21  ;;  %v103_v30 = vld [vmem:[%s1563_s1 + $0x1a8] sm:$0xff]  ;;  %v839_v33 = vpack.c.bf16 %v55_v28, %v54_v27  ;;  %v73_v36 = vld [vmem:[%s1563_s1 + $0xb8] sm:$0xff] }
   0x9   :  { %v86_v31 = vld [vmem:[%s1563_s1 + $0x120] sm:$0xff]  ;;  %v87_v32 = vld [vmem:[%s1563_s1 + $0x128] sm:$0xff]  ;;  %836 = vmatpush3.bf16.msra.mxu0 %v835_v17  ;;  %v869_v34 = vpack.c.bf16 %v103_v30, %v102_v29  ;;  %v56_v37 = vld [vmem:[%s1563_s1 + $0x30] sm:$0xff]  ;;  %v841_v39 = vpack.c.bf16 %v73_v36, %v72_v35 }
   0xa   :  { %838 = vmatprep.subr.bf16.mxu0 %v837_v26  ;;  %v871_v38 = vpack.c.bf16 %v87_v32, %v86_v31  ;;  %v57_v40 = vld [vmem:[%s1563_s1 + $0x38] sm:$0xff]  ;;  %v104_v41 = vld [vmem:[%s1563_s1 + $0x1b0] sm:$0xff]  ;;  %v74_v46 = vld [vmem:[%s1563_s1 + $0xc0] sm:$0xff] }
   0xb   :  { %868 = vmatpush3.bf16.msra.mxu1 %v867_v25  ;;  %v105_v42 = vld [vmem:[%s1563_s1 + $0x1b8] sm:$0xff]  ;;  %v88_v44 = vld [vmem:[%s1563_s1 + $0x130] sm:$0xff]  ;;  %v75_v47 = vld [vmem:[%s1563_s1 + $0xc8] sm:$0xff]  ;;  %v843_v48 = vpack.c.bf16 %v57_v40, %v56_v37 }
   0xc   :  { %870 = vmatprep.subr.bf16.mxu1 %v869_v34  ;;  %v873_v43 = vpack.c.bf16 %v105_v42, %v104_v41  ;;  %v89_v45 = vld [vmem:[%s1563_s1 + $0x138] sm:$0xff]  ;;  %v106_v49 = vld [vmem:[%s1563_s1 + $0x1c0] sm:$0xff]  ;;  %v107_v50 = vld [vmem:[%s1563_s1 + $0x1c8] sm:$0xff]  ;;  %v845_v52 = vpack.c.bf16 %v75_v47, %v74_v46 }
   0xd   :  { %840 = vmatpush3.bf16.msra.mxu0 %v839_v33  ;;  %v875_v51 = vpack.c.bf16 %v89_v45, %v88_v44  ;;  %v58_v53 = vld [vmem:[%s1563_s1 + $0x40] sm:$0xff]  ;;  %v59_v54 = vld [vmem:[%s1563_s1 + $0x48] sm:$0xff]  ;;  %v877_v56 = vpack.c.bf16 %v107_v50, %v106_v49  ;;  %v76_v58 = vld [vmem:[%s1563_s1 + $0xd0] sm:$0xff] }
   0xe   :  { %842 = vmatprep.subr.bf16.mxu0 %v841_v39  ;;  %v90_v55 = vld [vmem:[%s1563_s1 + $0x140] sm:$0xff]  ;;  %v91_v57 = vld [vmem:[%s1563_s1 + $0x148] sm:$0xff]  ;;  %v77_v59 = vld [vmem:[%s1563_s1 + $0xd8] sm:$0xff]  ;;  %v847_v62 = vpack.c.bf16 %v59_v54, %v58_v53 }
   0xf   :  { %872 = vmatpush3.bf16.msra.mxu1 %v871_v38  ;;  %v108_v60 = vld [vmem:[%s1563_s1 + $0x1d0] sm:$0xff]  ;;  %v109_v61 = vld [vmem:[%s1563_s1 + $0x1d8] sm:$0xff]  ;;  %v879_v63 = vpack.c.bf16 %v91_v57, %v90_v55  ;;  %v849_v0 = vpack.c.bf16 %v77_v59, %v76_v58  ;;  %v78_v6 = vld [vmem:[%s1563_s1 + $0xe0] sm:$0xff] }
  0x10   :  { %874 = vmatprep.subr.bf16.mxu1 %v873_v43  ;;  %v60_v1 = vld [vmem:[%s1563_s1 + $0x50] sm:$0xff]  ;;  %v61_v2 = vld [vmem:[%s1563_s1 + $0x58] sm:$0xff]  ;;  %v881_v4 = vpack.c.bf16 %v109_v61, %v108_v60  ;;  %v79_v7 = vld [vmem:[%s1563_s1 + $0xe8] sm:$0xff] }
  0x11   :  { %844 = vmatpush3.bf16.msra.mxu0 %v843_v48  ;;  %v92_v3 = vld [vmem:[%s1563_s1 + $0x150] sm:$0xff]  ;;  %v93_v5 = vld [vmem:[%s1563_s1 + $0x158] sm:$0xff]  ;;  %v110_v8 = vld [vmem:[%s1563_s1 + $0x1e0] sm:$0xff]  ;;  %v851_v10 = vpack.c.bf16 %v61_v2, %v60_v1  ;;  %v853_v14 = vpack.c.bf16 %v79_v7, %v78_v6 }
  0x12   :  { %846 = vmatprep.subr.bf16.mxu0 %v845_v52  ;;  %v111_v9 = vld [vmem:[%s1563_s1 + $0x1e8] sm:$0xff]  ;;  %v62_v11 = vld [vmem:[%s1563_s1 + $0x60] sm:$0xff]  ;;  %v883_v13 = vpack.c.bf16 %v93_v5, %v92_v3  ;;  %v80_v19 = vld [vmem:[%s1563_s1 + $0xf0] sm:$0xff] }
  0x13   :  { %876 = vmatpush3.bf16.msra.mxu1 %v875_v51  ;;  %v63_v12 = vld [vmem:[%s1563_s1 + $0x68] sm:$0xff]  ;;  %v94_v15 = vld [vmem:[%s1563_s1 + $0x160] sm:$0xff]  ;;  %v885_v18 = vpack.c.bf16 %v111_v9, %v110_v8  ;;  %v81_v20 = vld [vmem:[%s1563_s1 + $0xf8] sm:$0xff] }
  0x14   :  { %878 = vmatprep.subr.bf16.mxu1 %v877_v56  ;;  %v95_v16 = vld [vmem:[%s1563_s1 + $0x168] sm:$0xff]  ;;  %v21_v21 = vld [vmem:[%s1562_s0 + $0x18] sm:$0xff]  ;;  %v112_v22 = vld [vmem:[%s1563_s1 + $0x1f0] sm:$0xff]  ;;  %v855_v24 = vpack.c.bf16 %v63_v12, %v62_v11  ;;  %v857_v26 = vpack.c.bf16 %v81_v20, %v80_v19 }
  0x15   :  { %848 = vmatpush3.bf16.msra.mxu0 %v847_v62  ;;  %v19_v17 = vld [vmem:[%s1562_s0 + $0x8] sm:$0xff]  ;;  %v113_v23 = vld [vmem:[%s1563_s1 + $0x1f8] sm:$0xff]  ;;  %334 = vmatprep.mubr.f32.mxu1 %v21_v21  ;;  %v887_v25 = vpack.c.bf16 %v95_v16, %v94_v15  ;;  %v64_v27 = vld [vmem:[%s1563_s1 + $0x70] sm:$0xff] }
  0x16   :  { %850 = vmatprep.subr.bf16.mxu0 %v849_v0  ;;  %249 = vmatprep.mubr.f32.mxu0 %v19_v17  ;;  %v65_v28 = vld [vmem:[%s1563_s1 + $0x78] sm:$0xff]  ;;  %v96_v29 = vld [vmem:[%s1563_s1 + $0x170] sm:$0xff]  ;;  %v889_v30 = vpack.c.bf16 %v113_v23, %v112_v22  ;;  %v130_v32 = vld [vmem:[%s1563_s1 + $0x280] sm:$0xff] }
  0x17   :  { %880 = vmatpush3.bf16.msra.mxu1 %v879_v63  ;;  %v97_v31 = vld [vmem:[%s1563_s1 + $0x178] sm:$0xff]  ;;  %v131_v33 = vld [vmem:[%s1563_s1 + $0x288] sm:$0xff]  ;;  %v162_v34 = vld [vmem:[%s1563_s1 + $0x380] sm:$0xff]  ;;  %v859_v36 = vpack.c.bf16 %v65_v28, %v64_v27 }
  0x18   :  { %882 = vmatprep.subr.bf16.mxu1 %v881_v4  ;;  %v163_v35 = vld [vmem:[%s1563_s1 + $0x388] sm:$0xff]  ;;  %v891_v37 = vpack.c.bf16 %v97_v31, %v96_v29  ;;  %v893_v38 = vpack.c.bf16 %v131_v33, %v130_v32  ;;  %v114_v39 = vld [vmem:[%s1563_s1 + $0x200] sm:$0xff]  ;;  %v132_v44 = vld [vmem:[%s1563_s1 + $0x290] sm:$0xff] }
  0x19   :  { %852 = vmatpush3.bf16.msra.mxu0 %v851_v10  ;;  %v115_v40 = vld [vmem:[%s1563_s1 + $0x208] sm:$0xff]  ;;  %v146_v41 = vld [vmem:[%s1563_s1 + $0x300] sm:$0xff]  ;;  %v925_v42 = vpack.c.bf16 %v163_v35, %v162_v34  ;;  %v133_v45 = vld [vmem:[%s1563_s1 + $0x298] sm:$0xff] }
  0x1a   :  { %854 = vmatprep.subr.bf16.mxu0 %v853_v14  ;;  %v147_v43 = vld [vmem:[%s1563_s1 + $0x308] sm:$0xff]  ;;  %v164_v46 = vld [vmem:[%s1563_s1 + $0x390] sm:$0xff]  ;;  %v165_v47 = vld [vmem:[%s1563_s1 + $0x398] sm:$0xff]  ;;  %v895_v49 = vpack.c.bf16 %v115_v40, %v114_v39  ;;  %v897_v52 = vpack.c.bf16 %v133_v45, %v132_v44 }
  0x1b   :  { %884 = vmatpush3.bf16.msra.mxu1 %v883_v13  ;;  %v18_v48 = vld [vmem:[%s1562_s0] sm:$0xff]  ;;  %v20_v50 = vld [vmem:[%s1562_s0 + $0x10] sm:$0xff]  ;;  %v927_v51 = vpack.c.bf16 %v147_v43, %v146_v41  ;;  %v117_v54 = vld [vmem:[%s1563_s1 + $0x218] sm:$0xff]  ;;  %v929_v56 = vpack.c.bf16 %v165_v47, %v164_v46 }
  0x1c   :  { %886 = vmatprep.subr.bf16.mxu1 %v885_v18  ;;  %v116_v53 = vld [vmem:[%s1563_s1 + $0x210] sm:$0xff]  ;;  %v149_v57 = vld [vmem:[%s1563_s1 + $0x318] sm:$0xff]  ;;  %v134_v58 = vld [vmem:[%s1563_s1 + $0x2a0] sm:$0xff] }
  0x1d   :  { %856 = vmatpush3.bf16.msra.mxu0 %v855_v24  ;;  %v148_v55 = vld [vmem:[%s1563_s1 + $0x310] sm:$0xff]  ;;  %v135_v59 = vld [vmem:[%s1563_s1 + $0x2a8] sm:$0xff]  ;;  %v166_v60 = vld [vmem:[%s1563_s1 + $0x3a0] sm:$0xff]  ;;  %v899_v63 = vpack.c.bf16 %v117_v54, %v116_v53 }
  0x1e   :  { %858 = vmatprep.subr.bf16.mxu0 %v857_v26  ;;  %v167_v61 = vld [vmem:[%s1563_s1 + $0x3a8] sm:$0xff]  ;;  %v118_v0 = vld [vmem:[%s1563_s1 + $0x220] sm:$0xff]  ;;  %v29_v2 = vld [vmem:[%s1562_s0 + $0x58] sm:$0xff]  ;;  %v931_v3 = vpack.c.bf16 %v149_v57, %v148_v55  ;;  %v901_v4 = vpack.c.bf16 %v135_v59, %v134_v58 }
  0x1f   :  { %888 = vmatpush3.bf16.msra.mxu1 %v887_v25  ;;  %v27_v62 = vld [vmem:[%s1562_s0 + $0x48] sm:$0xff]  ;;  %v26_v1 = vld [vmem:[%s1562_s0 + $0x40] sm:$0xff]  ;;  %v28_v7 = vld [vmem:[%s1562_s0 + $0x50] sm:$0xff]  ;;  %v933_v8 = vpack.c.bf16 %v167_v61, %v166_v60 }
  0x20   :  { %890 = vmatprep.subr.bf16.mxu1 %v889_v30  ;;  %v119_v5 = vld [vmem:[%s1563_s1 + $0x228] sm:$0xff]  ;;  %v150_v6 = vld [vmem:[%s1563_s1 + $0x320] sm:$0xff]  ;;  %v136_v10 = vld [vmem:[%s1563_s1 + $0x2b0] sm:$0xff] }
  0x21   :  { %860 = vmatpush3.bf16.msra.mxu0 %v859_v36  ;;  %v151_v9 = vld [vmem:[%s1563_s1 + $0x328] sm:$0xff]  ;;  %v137_v11 = vld [vmem:[%s1563_s1 + $0x2b8] sm:$0xff]  ;;  %v168_v12 = vld [vmem:[%s1563_s1 + $0x3b0] sm:$0xff]  ;;  %v903_v15 = vpack.c.bf16 %v119_v5, %v118_v0 }
  0x22   :  { %894 = vmatprep.subr.bf16.mxu0 %v893_v38  ;;  %v169_v13 = vld [vmem:[%s1563_s1 + $0x3b8] sm:$0xff]  ;;  %v35_v14 = vld [vmem:[%s1562_s0 + $0x88] sm:$0xff]  ;;  %v120_v16 = vld [vmem:[%s1563_s1 + $0x230] sm:$0xff]  ;;  %v935_v19 = vpack.c.bf16 %v151_v9, %v150_v6  ;;  %v905_v20 = vpack.c.bf16 %v137_v11, %v136_v10 }
  0x23   :  { %892 = vmatpush3.bf16.msra.mxu1 %v891_v37  ;;  %v34_v17 = vld [vmem:[%s1562_s0 + $0x80] sm:$0xff]  ;;  %v37_v18 = vld [vmem:[%s1562_s0 + $0x98] sm:$0xff]  ;;  %v152_v22 = vld [vmem:[%s1563_s1 + $0x330] sm:$0xff]  ;;  %v937_v24 = vpack.c.bf16 %v169_v13, %v168_v12 }
  0x24   :  { %926 = vmatprep.subr.bf16.mxu1 %v925_v42  ;;  %250 = vmatmul.mubr.f32.vlgmr.msra.gmra.mrb[0].mxu0 %v18_v48  ;;  %v121_v21 = vld [vmem:[%s1563_s1 + $0x238] sm:$0xff]  ;;  %v36_v23 = vld [vmem:[%s1562_s0 + $0x90] sm:$0xff]  ;;  %v138_v26 = vld [vmem:[%s1563_s1 + $0x2c0] sm:$0xff] }
  0x25   :  { %896 = vmatpush3.bf16.msra.mxu0 %v895_v49  ;;  %254 = vmatprep.mubr.f32.mxu0 %v27_v62  ;;  %v153_v25 = vld [vmem:[%s1563_s1 + $0x338] sm:$0xff]  ;;  %v139_v27 = vld [vmem:[%s1563_s1 + $0x2c8] sm:$0xff]  ;;  %v170_v28 = vld [vmem:[%s1563_s1 + $0x3c0] sm:$0xff]  ;;  %v907_v31 = vpack.c.bf16 %v121_v21, %v120_v16 }
  0x26   :  { %335 = vmatmul.mubr.f32.vlgmr.msra.gmra.mrb[0].mxu1 %v20_v50  ;;  %898 = vmatprep.subr.bf16.mxu0 %v897_v52  ;;  %v171_v29 = vld [vmem:[%s1563_s1 + $0x3c8] sm:$0xff]  ;;  %v122_v32 = vld [vmem:[%s1563_s1 + $0x240] sm:$0xff]  ;;  %v45_v34 = vld [vmem:[%s1562_s0 + $0xd8] sm:$0xff]  ;;  %v939_v35 = vpack.c.bf16 %v153_v25, %v152_v22  ;;  %v909_v36 = vpack.c.bf16 %v139_v27, %v138_v26 }
  0x27   :  { %928 = vmatpush3.bf16.msra.mxu1 %v927_v51  ;;  %339 = vmatprep.mubr.f32.mxu1 %v29_v2  ;;  %v43_v30 = vld [vmem:[%s1562_s0 + $0xc8] sm:$0xff]  ;;  %v42_v33 = vld [vmem:[%s1562_s0 + $0xc0] sm:$0xff]  ;;  %v44_v39 = vld [vmem:[%s1562_s0 + $0xd0] sm:$0xff]  ;;  %v941_v40 = vpack.c.bf16 %v171_v29, %v170_v28 }
  0x28   :  { %930 = vmatprep.subr.bf16.mxu1 %v929_v56  ;;  %255 = vmatmul.mubr.f32.gmra.mrb[2].mxu0 %v26_v1  ;;  %v123_v37 = vld [vmem:[%s1563_s1 + $0x248] sm:$0xff]  ;;  %v154_v38 = vld [vmem:[%s1563_s1 + $0x340] sm:$0xff]  ;;  %v140_v42 = vld [vmem:[%s1563_s1 + $0x2d0] sm:$0xff] }
  0x29   :  { %900 = vmatpush3.bf16.msra.mxu0 %v899_v63  ;;  %259 = vmatprep.mubr.f32.mxu0 %v35_v14  ;;  %v155_v41 = vld [vmem:[%s1563_s1 + $0x348] sm:$0xff]  ;;  %v141_v43 = vld [vmem:[%s1563_s1 + $0x2d8] sm:$0xff]  ;;  %v172_v44 = vld [vmem:[%s1563_s1 + $0x3d0] sm:$0xff]  ;;  %v911_v46 = vpack.c.bf16 %v123_v37, %v122_v32 }
  0x2a   :  { %340 = vmatmul.mubr.f32.gmra.mrb[2].mxu1 %v28_v7  ;;  %902 = vmatprep.subr.bf16.mxu0 %v901_v4  ;;  %v173_v45 = vld [vmem:[%s1563_s1 + $0x3d8] sm:$0xff]  ;;  %v23_v47 = vld [vmem:[%s1562_s0 + $0x28] sm:$0xff]  ;;  %v943_v49 = vpack.c.bf16 %v155_v41, %v154_v38  ;;  %v913_v50 = vpack.c.bf16 %v141_v43, %v140_v42  ;;  %v124_v51 = vld [vmem:[%s1563_s1 + $0x250] sm:$0xff] }
  0x2b   :  { %932 = vmatpush3.bf16.msra.mxu1 %v931_v3  ;;  %344 = vmatprep.mubr.f32.mxu1 %v37_v18  ;;  %v25_v48 = vld [vmem:[%s1562_s0 + $0x38] sm:$0xff]  ;;  %v156_v53 = vld [vmem:[%s1563_s1 + $0x350] sm:$0xff]  ;;  %v945_v54 = vpack.c.bf16 %v173_v45, %v172_v44  ;;  %v142_v56 = vld [vmem:[%s1563_s1 + $0x2e0] sm:$0xff] }
  0x2c   :  { %934 = vmatprep.subr.bf16.mxu1 %v933_v8  ;;  %260 = vmatmul.mubr.f32.gmra.mrb[4].mxu0 %v34_v17  ;;  %v125_v52 = vld [vmem:[%s1563_s1 + $0x258] sm:$0xff]  ;;  %v143_v57 = vld [vmem:[%s1563_s1 + $0x2e8] sm:$0xff]  ;;  %v174_v58 = vld [vmem:[%s1563_s1 + $0x3e0] sm:$0xff] }
  0x2d   :  { %904 = vmatpush3.bf16.msra.mxu0 %v903_v15  ;;  %264 = vmatprep.mubr.f32.mxu0 %v43_v30  ;;  %v157_v55 = vld [vmem:[%s1563_s1 + $0x358] sm:$0xff]  ;;  %v175_v59 = vld [vmem:[%s1563_s1 + $0x3e8] sm:$0xff]  ;;  %v915_v60 = vpack.c.bf16 %v125_v52, %v124_v51  ;;  %v126_v61 = vld [vmem:[%s1563_s1 + $0x260] sm:$0xff]  ;;  %v917_v63 = vpack.c.bf16 %v143_v57, %v142_v56 }
  0x2e   :  { %345 = vmatmul.mubr.f32.gmra.mrb[4].mxu1 %v36_v23  ;;  %906 = vmatprep.subr.bf16.mxu0 %v905_v20  ;;  %v947_v62 = vpack.c.bf16 %v157_v55, %v156_v53  ;;  %v127_v0 = vld [vmem:[%s1563_s1 + $0x268] sm:$0xff]  ;;  %v158_v1 = vld [vmem:[%s1563_s1 + $0x360] sm:$0xff] }
  0x2f   :  { %936 = vmatpush3.bf16.msra.mxu1 %v935_v19  ;;  %349 = vmatprep.mubr.f32.mxu1 %v45_v34 }
  0x30   :  { %938 = vmatprep.subr.bf16.mxu1 %v937_v24  ;;  %265 = vmatmul.mubr.f32.gmra.mrb[6].mxu0 %v42_v33 }
  0x31   :  { %908 = vmatpush3.bf16.msra.mxu0 %v907_v31  ;;  %419 = vmatprep.mubr.f32.mxu0 %v23_v47 }
  0x32   :  { %350 = vmatmul.mubr.f32.gmra.mrb[6].mxu1 %v44_v39  ;;  %910 = vmatprep.subr.bf16.mxu0 %v909_v36 }
  0x33   :  { %940 = vmatpush3.bf16.msra.mxu1 %v939_v35  ;;  %504 = vmatprep.mubr.f32.mxu1 %v25_v48 }
  0x34   :  { %942 = vmatprep.subr.bf16.mxu1 %v941_v40 }
  0x35   :  { %912 = vmatpush3.bf16.msra.mxu0 %v911_v46 }
  0x36   :  { %914 = vmatprep.subr.bf16.mxu0 %v913_v50 }
  0x37   :  { %944 = vmatpush3.bf16.msra.mxu1 %v943_v49 }
  0x38   :  { %11 = vsyncpa [#allocation5], 0  ;;  %946 = vmatprep.subr.bf16.mxu1 %v945_v54  ;;  %v949_v2 = vpack.c.bf16 %v175_v59, %v174_v58  ;;  %v159_v3 = vld [vmem:[%s1563_s1 + $0x368] sm:$0xff]  ;;  %v144_v4 = vld [vmem:[%s1563_s1 + $0x2f0] sm:$0xff]  ;;  %v919_v8 = vpack.c.bf16 %v127_v0, %v126_v61  ;;  %vm541_vm0 = vcmask 1043456   ;;  %vm606_vm1 = vcmask 1041409  }
  0x39   :  { %v145_v5 = vld [vmem:[%s1563_s1 + $0x2f8] sm:$0xff]  ;;  %v176_v6 = vld [vmem:[%s1563_s1 + $0x3f0] sm:$0xff]  ;;  %916 = vmatpush3.bf16.msra.mxu0 %v915_v60  ;;  %v951_v9 = vpack.c.bf16 %v159_v3, %v158_v1  ;;  %v22_v18 = vld [vmem:[%s1562_s0 + $0x20] sm:$0xff]  ;;  %vm608_vm2 = vcmask 1042434  }
  0x3a   :  { %v177_v7 = vld [vmem:[%s1563_s1 + $0x3f8] sm:$0xff]  ;;  %918 = vmatprep.subr.bf16.mxu0 %v917_v63  ;;  %v921_v10 = vpack.c.bf16 %v145_v5, %v144_v4  ;;  %v128_v11 = vld [vmem:[%s1563_s1 + $0x270] sm:$0xff]  ;;  %v31_v20 = vld [vmem:[%s1562_s0 + $0x68] sm:$0xff] }
  0x3b   :  { %948 = vmatpush3.bf16.msra.mxu1 %v947_v62  ;;  %v129_v12 = vld [vmem:[%s1563_s1 + $0x278] sm:$0xff]  ;;  %v953_v13 = vpack.c.bf16 %v177_v7, %v176_v6  ;;  %v160_v14 = vld [vmem:[%s1563_s1 + $0x370] sm:$0xff]  ;;  %v30_v22 = vld [vmem:[%s1562_s0 + $0x60] sm:$0xff] }
  0x3c   :  { %950 = vmatprep.subr.bf16.mxu1 %v949_v2  ;;  %v161_v15 = vld [vmem:[%s1563_s1 + $0x378] sm:$0xff]  ;;  %v923_v16 = vpack.c.bf16 %v129_v12, %v128_v11  ;;  %v24_v19 = vld [vmem:[%s1562_s0 + $0x30] sm:$0xff]  ;;  %v39_v24 = vld [vmem:[%s1562_s0 + $0xa8] sm:$0xff] }
  0x3d   :  { %920 = vmatpush3.bf16.msra.mxu0 %v919_v8  ;;  %v955_v17 = vpack.c.bf16 %v161_v15, %v160_v14  ;;  %v33_v21 = vld [vmem:[%s1562_s0 + $0x78] sm:$0xff]  ;;  %v32_v23 = vld [vmem:[%s1562_s0 + $0x70] sm:$0xff]  ;;  %v38_v26 = vld [vmem:[%s1562_s0 + $0xa0] sm:$0xff] }
  0x3e   :  { %922 = vmatprep.subr.bf16.mxu0 %v921_v10  ;;  %v41_v25 = vld [vmem:[%s1562_s0 + $0xb8] sm:$0xff]  ;;  %v40_v27 = vld [vmem:[%s1562_s0 + $0xb0] sm:$0xff]  ;;  %v47_v28 = vld [vmem:[%s1562_s0 + $0xe8] sm:$0xff] }
  0x3f   :  { %952 = vmatpush3.bf16.msra.mxu1 %v951_v9  ;;  %v49_v29 = vld [vmem:[%s1562_s0 + $0xf8] sm:$0xff]  ;;  %v46_v30 = vld [vmem:[%s1562_s0 + $0xe0] sm:$0xff]  ;;  %v48_v31 = vld [vmem:[%s1562_s0 + $0xf0] sm:$0xff]  ;;  %s1009_s0 = smov [#allocation2]  }
  0x40   :  { %954 = vmatprep.subr.bf16.mxu1 %v953_v13  ;;  %v652_v33 = vld [vmem:[%s1564_s2] ss:$0 sm:$0xff]  ;;  %s627_s2 = sshll.u32 %s1009_s0, 4  ;;  %s1527_s2 = int_to_ptr.vmem [resolvable:$true] %s627_s2 }
  0x41   :  { %924 = vmatpush3.bf16.msra.mxu0 %v923_v16  ;;  %s961_s24 = scalar_lea.vmem %s1527_s2, 512  ;;  %p966_p1 = scmp.lt.s32.totalorder %s1527_s2, %s1527_s2 }
  0x42   :  { %p962_p0 = scmp.ne.s32.totalorder %s1527_s2, %s961_s24  ;;  %p967_p2 = scmp.lt.s32.totalorder %s961_s24, %s961_s24 }
  0x43   :  { %956 = vmatpush3.bf16.msra.mxu1 %v955_v17 }
  0x44   :  { %420 = vmatmul.mubr.f32.vlgmr.msra.gmra.mrb[8].mxu0 %v22_v18  ;;  %p968_p3 = por %p967_p2, %p966_p1 }
  0x45   :  { %424 = vmatprep.mubr.f32.mxu0 %v31_v20 }
  0x46   :  { %505 = vmatmul.mubr.f32.vlgmr.msra.gmra.mrb[8].mxu1 %v24_v19  ;;  %p969_p4 = pnand %p968_p3, %p962_p0 }
  0x47   :  { %509 = vmatprep.mubr.f32.mxu1 %v33_v21 }
  0x48   :  { %425 = vmatmul.mubr.f32.gmra.mrb[10].mxu0 %v30_v22 }
  0x49   :  { %429 = vmatprep.mubr.f32.mxu0 %v39_v24 }
  0x4a   :  { %510 = vmatmul.mubr.f32.gmra.mrb[10].mxu1 %v32_v23 }
  0x4b   :  { %514 = vmatprep.mubr.f32.mxu1 %v41_v25 }
  0x4c   :  { %430 = vmatmul.mubr.f32.gmra.mrb[12].mxu0 %v38_v26 }
  0x4d   :  { %434 = vmatprep.mubr.f32.mxu0 %v47_v28 }
  0x4e   :  { %515 = vmatmul.mubr.f32.gmra.mrb[12].mxu1 %v40_v27 }
  0x4f   :  { %519 = vmatprep.mubr.f32.mxu1 %v49_v29 }
  0x50   :  { %435 = vmatmul.mubr.f32.gmra.mrb[14].mxu0 %v46_v30 }
  0x52   :  { %520 = vmatmul.mubr.f32.gmra.mrb[14].mxu1 %v48_v31 }
  0xf7   :  { %v685_v32 = vpop.f32.mrb[0].mxu0 }
  0xf8   :  { %v686_v34 = vpop.f32.mrb[1].mxu0 }
  0xf9   :  { %v729_v35 = vpop.f32.mrb[0].mxu1  ;;  %v687_v36 = vadd.f32 %v686_v34, %v685_v32 }
  0xfa   :  { %v730_v37 = vpop.f32.mrb[1].mxu1 }
  0xfb   :  { %v731_v38 = vadd.f32 %v730_v37, %v729_v35  ;;  %v252_v39 = vadd.f32 %v687_v36, %v652_v33  ;;  %v688_v40 = vpop.f32.mrb[2].mxu0 }
  0xfc   :  { %v689_v41 = vpop.f32.mrb[3].mxu0 }
  0xfd   :  { %v732_v42 = vpop.f32.mrb[2].mxu1  ;;  %v337_v43 = vadd.f32 %v731_v38, %v252_v39  ;;  %v690_v44 = vadd.f32 %v689_v41, %v688_v40 }
  0xfe   :  { %v733_v45 = vpop.f32.mrb[3].mxu1 }
  0xff   :  { %v734_v46 = vadd.f32 %v733_v45, %v732_v42  ;;  %v257_v47 = vadd.f32 %v690_v44, %v652_v33  ;;  %v691_v48 = vpop.f32.mrb[4].mxu0 }
 0x100   :  { %v692_v49 = vpop.f32.mrb[5].mxu0 }
 0x101   :  { %v735_v50 = vpop.f32.mrb[4].mxu1  ;;  %v342_v51 = vadd.f32 %v734_v46, %v257_v47  ;;  %v693_v52 = vadd.f32 %v692_v49, %v691_v48 }
 0x102   :  { %v736_v53 = vpop.f32.mrb[5].mxu1 }
 0x103   :  { %v737_v54 = vadd.f32 %v736_v53, %v735_v50  ;;  %v262_v55 = vadd.f32 %v693_v52, %v652_v33  ;;  %v694_v56 = vpop.f32.mrb[6].mxu0 }
 0x104   :  { %v695_v57 = vpop.f32.mrb[7].mxu0 }
 0x105   :  { %v738_v58 = vpop.f32.mrb[6].mxu1  ;;  %v347_v59 = vadd.f32 %v737_v54, %v262_v55  ;;  %v696_v60 = vadd.f32 %v695_v57, %v694_v56 }
 0x106   :  { %v739_v61 = vpop.f32.mrb[7].mxu1 }
 0x107   :  { %v740_v62 = vadd.f32 %v739_v61, %v738_v58  ;;  %v267_v63 = vadd.f32 %v696_v60, %v652_v33 }
 0x109   :  { %v352_v0 = vadd.f32 %v740_v62, %v267_v63 }
 0x117   :  { %v773_v1 = vpop.f32.mrb[8].mxu0 }
 0x118   :  { %v774_v2 = vpop.f32.mrb[9].mxu0 }
 0x119   :  { %v817_v3 = vpop.f32.mrb[8].mxu1  ;;  %v775_v4 = vadd.f32 %v774_v2, %v773_v1 }
 0x11a   :  { %v818_v5 = vpop.f32.mrb[9].mxu1 }
 0x11b   :  { %v819_v6 = vadd.f32 %v818_v5, %v817_v3  ;;  %v422_v7 = vadd.f32 %v775_v4, %v337_v43  ;;  %v776_v8 = vpop.f32.mrb[10].mxu0 }
 0x11c   :  { %v777_v9 = vpop.f32.mrb[11].mxu0 }
 0x11d   :  { %v820_v10 = vpop.f32.mrb[10].mxu1  ;;  %v507_v11 = vadd.f32 %v819_v6, %v422_v7  ;;  %v778_v12 = vadd.f32 %v777_v9, %v776_v8 }
 0x11e   :  { %v821_v13 = vpop.f32.mrb[11].mxu1 }
 0x11f   :  { %v822_v14 = vadd.f32 %v821_v13, %v820_v10  ;;  %525 = vst [vmem:[#allocation2] sm:$0xff] %v507_v11  ;;  %v533_v15 = vcombine.high %v507_v11, %v507_v11  ;;  %v542_v16 = vsel %vm541_vm0, %v507_v11, -inf  ;;  %v427_v17 = vadd.f32 %v778_v12, %v342_v51  ;;  %v779_v18 = vpop.f32.mrb[12].mxu0 }
 0x120   :  { %v543_v19 = vrot.slane %v542_v16, 4  ;;  %v780_v20 = vpop.f32.mrb[13].mxu0 }
 0x121   :  { %v823_v21 = vpop.f32.mrb[12].mxu1  ;;  %v549_v22 = vsel %vm541_vm0, %v533_v15, -inf  ;;  %v512_v23 = vadd.f32 %v822_v14, %v427_v17  ;;  %v781_v24 = vadd.f32 %v780_v20, %v779_v18 }
 0x122   :  { %v824_v25 = vpop.f32.mrb[13].mxu1  ;;  %v544_v26 = vmax.f32 %v542_v16, %v543_v19  ;;  %v550_v27 = vrot.slane %v549_v22, 4 }
 0x123   :  { %v825_v28 = vadd.f32 %v824_v25, %v823_v21  ;;  %526 = vst [vmem:[#allocation2 + $0x8] sm:$0xff] %v512_v23  ;;  %v534_v29 = vcombine.high %v512_v23, %v512_v23  ;;  %v556_v30 = vsel %vm541_vm0, %v512_v23, -inf  ;;  %v432_v31 = vadd.f32 %v781_v24, %v347_v59  ;;  %v782_v32 = vpop.f32.mrb[14].mxu0 }
 0x124   :  { %v545_v33 = vrot.slane %v544_v26, 2  ;;  %v551_v34 = vmax.f32 %v549_v22, %v550_v27  ;;  %v557_v35 = vrot.slane %v556_v30, 4  ;;  %v783_v36 = vpop.f32.mrb[15].mxu0 }
 0x125   :  { %v826_v37 = vpop.f32.mrb[14].mxu1  ;;  %v563_v38 = vsel %vm541_vm0, %v534_v29, -inf  ;;  %v517_v39 = vadd.f32 %v825_v28, %v432_v31  ;;  %v784_v40 = vadd.f32 %v783_v36, %v782_v32 }
 0x126   :  { %v827_v41 = vpop.f32.mrb[15].mxu1  ;;  %v546_v42 = vmax.f32 %v544_v26, %v545_v33  ;;  %v552_v43 = vrot.slane %v551_v34, 2  ;;  %v558_v44 = vmax.f32 %v556_v30, %v557_v35  ;;  %v564_v45 = vrot.slane %v563_v38, 4 }
 0x127   :  { %527 = vst [vmem:[#allocation2 + $0x10] sm:$0xff] %v517_v39  ;;  %v535_v46 = vcombine.high %v517_v39, %v517_v39  ;;  %v570_v47 = vsel %vm541_vm0, %v517_v39, -inf  ;;  %v437_v48 = vadd.f32 %v784_v40, %v352_v0  ;;  %v828_v49 = vadd.f32 %v827_v41, %v826_v37 }
 0x128   :  { %v553_v50 = vmax.f32 %v551_v34, %v552_v43  ;;  %v559_v51 = vrot.slane %v558_v44, 2  ;;  %v565_v52 = vmax.f32 %v563_v38, %v564_v45  ;;  %v547_v53 = vrot.slane %v546_v42, 1 }
 0x129   :  { %v571_v54 = vrot.slane %v570_v47, 4  ;;  %v577_v55 = vsel %vm541_vm0, %v535_v46, -inf  ;;  %v522_v56 = vadd.f32 %v828_v49, %v437_v48 }
 0x12a   :  { %v554_v57 = vrot.slane %v553_v50, 1  ;;  %v560_v58 = vmax.f32 %v558_v44, %v559_v51  ;;  %v566_v59 = vrot.slane %v565_v52, 2  ;;  %v578_v61 = vrot.slane %v577_v55, 4 }
 0x12b   :  { %v572_v60 = vmax.f32 %v570_v47, %v571_v54  ;;  %528 = vst [vmem:[#allocation2 + $0x18] sm:$0xff] %v522_v56  ;;  %v536_v62 = vcombine.high %v522_v56, %v522_v56  ;;  %v584_v63 = vsel %vm541_vm0, %v522_v56, -inf }
 0x12c   :  { %v555_v0 = vmax.f32 %v553_v50, %v554_v57  ;;  %v561_v1 = vrot.slane %v560_v58, 1  ;;  %v567_v2 = vmax.f32 %v565_v52, %v566_v59  ;;  %v585_v3 = vrot.slane %v584_v63, 4 }
 0x12d   :  { %972 = shalt.err (!%p969_p4)
}
 0x12e   :  { %s973_s1 = scalar_lea.hbm %s1565_s3, 512 }
 0x12f   :  { %p974_p5 = scmp.ne.s32.totalorder %s1565_s3, %s973_s1  ;;  %p977_p6 = scmp.lt.u32.totalorder %s973_s1, %s1565_s3 }
 0x131   :  { %p979_p7 = pnand %p977_p6, %p974_p5 }
 0x133   :  { %982 = shalt.err (!%p979_p7)
}
 0x134   :  { %s1010_s5 = smov 128   ;;  %s1011_s6 = smov 8   ;;  %v548_v4 = vmax.f32 %v546_v42, %v547_v53  ;;  %v573_v5 = vrot.slane %v572_v60, 2  ;;  %v579_v6 = vmax.f32 %v577_v55, %v578_v61  ;;  %v591_v7 = vsel %vm541_vm0, %v536_v62, -inf }
 0x135   :  { %633 = dma.vmem_to_hbm [thread:$0]  %s1527_s2, 512, %s1565_s3, [#allocation3], %s1010_s5, %s1010_s5, %s1011_s6   ;;  %v562_v8 = vmax.f32 %v560_v58, %v561_v1  ;;  %v568_v9 = vrot.slane %v567_v2, 1  ;;  %v586_v10 = vmax.f32 %v584_v63, %v585_v3  ;;  %v592_v11 = vrot.slane %v591_v7, 4 }
 0x136   :  { %v574_v12 = vmax.f32 %v572_v60, %v573_v5  ;;  %v580_v13 = vrot.slane %v579_v6, 2  ;;  %v607_v14 = vsel %vm606_vm1, %v555_v0, %v548_v4  ;;  %vm610_vm3 = vcmask 1043459   ;;  %s1012_s3 = smov [#allocation4]  }
 0x137   :  { %v569_v15 = vmax.f32 %v567_v2, %v568_v9  ;;  %v587_v16 = vrot.slane %v586_v10, 2  ;;  %v593_v17 = vmax.f32 %v591_v7, %v592_v11  ;;  %v609_v18 = vsel %vm608_vm2, %v562_v8, %v607_v14  ;;  %s640_s9 = sshll.u32 %s1012_s3, 4  ;;  %s641_s9 = int_to_ptr.vmem [resolvable:$true] %s640_s9 }
 0x138   :  { %v575_v19 = vrot.slane %v574_v12, 1  ;;  %v581_v20 = vmax.f32 %v579_v6, %v580_v13  ;;  %vm612_vm4 = vcmask 1044484   ;;  %vm614_vm5 = vcmask 1045509   ;;  %s983_s10 = scalar_lea.vmem %s641_s9, 128  ;;  %p988_p9 = scmp.lt.s32.totalorder %s641_s9, %s641_s9 }
 0x139   :  { %v588_v21 = vmax.f32 %v586_v10, %v587_v16  ;;  %v594_v22 = vrot.slane %v593_v17, 2  ;;  %v611_v23 = vsel %vm610_vm3, %v569_v15, %v609_v18  ;;  %vm616_vm6 = vcmask 1046534   ;;  %p984_p8 = scmp.ne.s32.totalorder %s641_s9, %s983_s10  ;;  %p989_p10 = scmp.lt.s32.totalorder %s983_s10, %s983_s10 }
 0x13a   :  { %v576_v24 = vmax.f32 %v574_v12, %v575_v19  ;;  %v582_v25 = vrot.slane %v581_v20, 1  ;;  %vm618_vm7 = vcmask 1047559  }
 0x13b   :  { %v589_v26 = vrot.slane %v588_v21, 1  ;;  %v595_v27 = vmax.f32 %v593_v17, %v594_v22  ;;  %p990_p11 = por %p989_p10, %p988_p9 }
 0x13c   :  { %v583_v28 = vmax.f32 %v581_v20, %v582_v25  ;;  %v613_v29 = vsel %vm612_vm4, %v576_v24, %v611_v23 }
 0x13d   :  { %v590_v30 = vmax.f32 %v588_v21, %v589_v26  ;;  %v596_v31 = vrot.slane %v595_v27, 1  ;;  %p991_p12 = pnand %p990_p11, %p984_p8 }
 0x13e   :  { %v615_v32 = vsel %vm614_vm5, %v583_v28, %v613_v29 }
 0x13f   :  { %v597_v33 = vmax.f32 %v595_v27, %v596_v31  ;;  %v617_v34 = vsel %vm616_vm6, %v590_v30, %v615_v32 }
 0x141   :  { %v619_v35 = vsel %vm618_vm7, %v597_v33, %v617_v34 }
 0x142   :  { %621 = vst [vmem:[#allocation4] sm:$0xff] %v619_v35 }
 0x143   :  { %994 = shalt.err (!%p991_p12)
}
 0x144   :  { %s995_s13 = scalar_lea.hbm %s1566_s4, 128 }
 0x145   :  { %p996_p13 = scmp.ne.s32.totalorder %s1566_s4, %s995_s13  ;;  %p999_p0 = scmp.lt.u32.totalorder %s995_s13, %s1566_s4 }
 0x147   :  { %p1001_p1 = pnand %p999_p0, %p996_p13 }
 0x149   :  { %1004 = shalt.err (!%p1001_p1)
}
 0x14a   :  { %643 = dma.vmem_to_hbm [thread:$0]  %s641_s9, 128, %s1566_s4, [#allocation5]  }
 0x14b   :  { %1005 = dma.done.wait [#allocation3], 512  }
 0x14c   :  { %1006 = vsyncadd [#allocation3], 4294966784 }
 0x14d   :  { %1007 = dma.done.wait [#allocation5], 128  }
 0x14e   :  { %1008 = vsyncadd [#allocation5], 4294967168 }
 0x14f   :  { %650 = vsyncpa [#allocation3], 1 }
 0x150   :  { %651 = vsyncpa [#allocation5], 1 }

</bundles_post_ra>
